<compile_context>
chip_gen: v7x
topology: tpu7x:2x2x1
jax: 0.10.0
libtpu: 0.0.40
codegen_flags: <defaults>
</compile_context>

<pallas_src>
import functools

import jax
import jax.numpy as jnp
from jax.experimental import pallas as pl
from jax.experimental.pallas import tpu as pltpu


def shortnet_kernel(x_ref, w_in_ref, b_in_ref, w_h1_ref, b_h1_ref, w_h2o_ref,
                    o_ref, *, num_hid):
    H = num_hid
    x = x_ref[...]                        # (2, TILE_B)   batch in lanes
    w_in = w_in_ref[...]                  # (2H+1, 2)     torch (out, in) layout
    b_in = b_in_ref[...]                  # (2H+1, 1)

    # K=2 input projections as two VPU broadcast multiply-adds (outer products)
    # instead of a K=2 MXU pass: inp = W_in @ X + b_in, fused for hid1/hid2/out.
    # (Sublane replication of the x rows is layout-level; XLU/vld slots are idle.)
    inp = (w_in[:, 0:1] * x[0:1, :]
           + w_in[:, 1:2] * x[1:2, :]
           + b_in)                        # (2H+1, TILE_B)

    hid1 = jnp.tanh(inp[0:H, :])          # (H, TILE_B)

    # Fused hid1 -> {hid2, out}: the only real MXU contraction (K = H).
    h1_proj = (jnp.dot(w_h1_ref[...], hid1,
                       preferred_element_type=jnp.float32)
               + b_h1_ref[...])           # (H+1, TILE_B)

    hid2 = jnp.tanh(inp[H:2 * H, :] + h1_proj[0:H, :])   # (H, TILE_B)

    pre_out = (inp[2 * H:2 * H + 1, :]                   # x->out (+ all out biases)
               + h1_proj[H:H + 1, :]                     # hid1->out
               + jnp.dot(w_h2o_ref[...], hid2,           # hid2->out
                         preferred_element_type=jnp.float32))  # (1, TILE_B)

    # sigmoid(x) = 0.5 * (1 + tanh(x/2)): EUP, stable for large |x|.
    o_ref[...] = 0.5 * (1.0 + jnp.tanh(0.5 * pre_out))


def pack_params(p, num_hid):
    """Fuse the six nn.Linear layers (natural torch (out, in) layout) into the
    three operands the kernel needs."""
    H = num_hid
    # All input projections stacked on the output axis.
    w_in = jnp.concatenate([p["w_ih1"], p["w_ih2"], p["w_io"]], axis=0)       # (2H+1, 2)
    # All three output-path biases are summed into the single output row here.
    b_out = p["b_io"] + p["b_h1o"] + p["b_h2o"]                               # (1,)
    b_in = jnp.concatenate([p["b_ih1"], p["b_ih2"], b_out], axis=0)[:, None]  # (2H+1, 1)
    # Both consumers of hid1 stacked on the output axis.
    w_h1 = jnp.concatenate([p["w_h1h2"], p["w_h1o"]], axis=0)                 # (H+1, H)
    b_h1 = jnp.concatenate([p["b_h1h2"],
                            jnp.zeros((1,), jnp.float32)], axis=0)[:, None]   # (H+1, 1)
    return w_in, b_in, w_h1, b_h1, p["w_h2o"]


_LANE_TILE = 512        # minimum batch tile (multiple of the 128-lane vreg width)
_TILE_B_MAX = 16384     # ~11 MB live activations -> safe on v7x (64 MiB VMEM) too


def _round_up(x, m):
    return ((x + m - 1) // m) * m


def _pick_tile_b(batch, tile_b=None):
    if tile_b is None:
        # Big enough to amortize the ~0.35 us/grid-step overhead, capped for
        # VMEM, and clamped so the grid keeps >=4 steps (both v7x TCs get work
        # via the "parallel" axis; on v5e/v6e the extra steps are harmless).
        tile_b = min(_TILE_B_MAX, _round_up(pl.cdiv(batch, 4), _LANE_TILE))
        tile_b = max(tile_b, _LANE_TILE)
    assert tile_b % _LANE_TILE == 0, "tile_b must be a multiple of 512"
    return tile_b


def shortnet_forward_lanes(x_lanes, params, *, num_hid, tile_b=None):
    """Fast path: x_lanes is (2, B) f32 (batch already in lanes). Returns (1, B).
    No transpose passes over the activation stream around the kernel."""
    H = num_hid
    B = x_lanes.shape[1]
    tile_b = _pick_tile_b(B, tile_b)
    num_tiles = pl.cdiv(B, tile_b)
    B_pad = num_tiles * tile_b
    if B_pad != B:
        # Padded columns only ever see finite bias-only values (no NaN risk);
        # they are sliced off below.
        x_lanes = jnp.pad(x_lanes, ((0, 0), (0, B_pad - B)))

    w_in, b_in, w_h1, b_h1, w_h2o = pack_params(params, H)
    kernel = functools.partial(shortnet_kernel, num_hid=H)

    flops = int(B_pad * (4 * (2 * H + 1) + 2 * (H + 1) * H + 2 * H))
    transcendentals = int(B_pad * (2 * H + 2))      # hid1/hid2 tanh + sigmoid tanh
    bytes_accessed = int(4 * (3 * B_pad
                              + 3 * (2 * H + 1)
                              + (H + 1) * (H + 1)
                              + H))

    out = pl.pallas_call(
        kernel,
        out_shape=jax.ShapeDtypeStruct((1, B_pad), jnp.float32),
        grid=(num_tiles,),
        in_specs=[
            pl.BlockSpec((2, tile_b), lambda i: (0, i)),        # x (pipelined)
            pl.BlockSpec((2 * H + 1, 2), lambda i: (0, 0)),     # w_in  (resident)
            pl.BlockSpec((2 * H + 1, 1), lambda i: (0, 0)),     # b_in  (resident)
            pl.BlockSpec((H + 1, H), lambda i: (0, 0)),         # w_h1  (resident)
            pl.BlockSpec((H + 1, 1), lambda i: (0, 0)),         # b_h1  (resident)
            pl.BlockSpec((1, H), lambda i: (0, 0)),             # w_h2o (resident)
        ],
        out_specs=pl.BlockSpec((1, tile_b), lambda i: (0, i)),  # lane-dense store
        compiler_params=pltpu.CompilerParams(
            dimension_semantics=("parallel",),
            vmem_limit_bytes=48 * 1024 * 1024),
        cost_estimate=pl.CostEstimate(
            flops=flops, transcendentals=transcendentals,
            bytes_accessed=bytes_accessed),
    )(x_lanes, w_in, b_in, w_h1, b_h1, w_h2o)

    return out[:, :B]                                           # (1, B)


def shortnet_forward(x, params, *, num_hid, tile_b=None):
    """Torch-layout convenience wrapper: x (B, 2) -> (B, 1).
    Prefer shortnet_forward_lanes((2, B)) to skip the two transpose passes."""
    out = shortnet_forward_lanes(x.T, params, num_hid=num_hid, tile_b=tile_b)
    return out.T                                                # (B, 1)


def init_params(key, num_hid):
    """nn.Linear-style init, natural torch layout: weight (out, in), bias (out,)."""
    def linear(k, fan_in, fan_out):
        kw, kb = jax.random.split(k)
        bound = 1.0 / jnp.sqrt(float(fan_in))
        w = jax.random.uniform(kw, (fan_out, fan_in), jnp.float32, -bound, bound)
        b = jax.random.uniform(kb, (fan_out,), jnp.float32, -bound, bound)
        return w, b

    keys = jax.random.split(key, 6)
    w_ih1, b_ih1 = linear(keys[0], 2, num_hid)          # lin_inp_hid1
    w_ih2, b_ih2 = linear(keys[1], 2, num_hid)          # lin_inp_hid2
    w_io, b_io = linear(keys[2], 2, 1)                  # lin_inp_out
    w_h1h2, b_h1h2 = linear(keys[3], num_hid, num_hid)  # lin_hid1_hid2
    w_h1o, b_h1o = linear(keys[4], num_hid, 1)          # lin_hid1_out
    w_h2o, b_h2o = linear(keys[5], num_hid, 1)          # lin_hid2_out
    return dict(w_ih1=w_ih1, b_ih1=b_ih1,
                w_ih2=w_ih2, b_ih2=b_ih2,
                w_io=w_io, b_io=b_io,
                w_h1h2=w_h1h2, b_h1h2=b_h1h2,
                w_h1o=w_h1o, b_h1o=b_h1o,
                w_h2o=w_h2o, b_h2o=b_h2o)


def shortnet_reference(x, p):
    """Pure-JAX reference matching the PyTorch forward (torch weight layout)."""
    x_inp_to_hid1 = x @ p["w_ih1"].T + p["b_ih1"]
    x_inp_to_hid2 = x @ p["w_ih2"].T + p["b_ih2"]
    x_inp_to_out = x @ p["w_io"].T + p["b_io"]
    hid1 = jnp.tanh(x_inp_to_hid1)
    hid2 = jnp.tanh(x_inp_to_hid2 + hid1 @ p["w_h1h2"].T + p["b_h1h2"])
    pre = (x_inp_to_out
           + hid1 @ p["w_h1o"].T + p["b_h1o"]
           + hid2 @ p["w_h2o"].T + p["b_h2o"])
    return jax.nn.sigmoid(pre)


if __name__ == "__main__":
    num_hid = 32
    batch = 640    # non-multiple of the lane tile -> exercises padding + 2 grid steps

    key = jax.random.PRNGKey(0)
    k_params, k_x = jax.random.split(key)
    params = init_params(k_params, num_hid)
    x = jax.random.normal(k_x, (batch, 2), jnp.float32)   # torch layout (B, 2)

    # Fast path: batch-in-lanes input, no wrapper transposes around the kernel.
    out_lanes = shortnet_forward_lanes(x.T, params, num_hid=num_hid)
    out_lanes = jax.block_until_ready(out_lanes)

    ref = shortnet_reference(x, params)                    # (batch, 1)
    assert out_lanes.shape == (1, batch)
    assert jnp.allclose(out_lanes, ref.T, atol=2e-5, rtol=2e-5), "lanes path mismatch"

    # Torch-layout convenience wrapper still matches the reference.
    out = jax.block_until_ready(shortnet_forward(x, params, num_hid=num_hid))
    assert out.shape == (batch, 1)
    assert jnp.allclose(out, ref, atol=2e-5, rtol=2e-5), "wrapper mismatch"

    print("KERNEL_OK")
</pallas_src>

<mosaic_0001>
module attributes {stable_mosaic.version = 11 : i64} {
  func.func @shortnet_kernel(%arg0: i32, %arg1: memref<2x512xf32, #tpu.memory_space<vmem>>, %arg2: memref<65x2xf32, #tpu.memory_space<vmem>>, %arg3: memref<65x1xf32, #tpu.memory_space<vmem>>, %arg4: memref<33x32xf32, #tpu.memory_space<vmem>>, %arg5: memref<33x1xf32, #tpu.memory_space<vmem>>, %arg6: memref<1x32xf32, #tpu.memory_space<vmem>>, %arg7: memref<1x512xf32, #tpu.memory_space<vmem>>) attributes {dimension_semantics = [#tpu.dimension_semantics<parallel>], iteration_bounds = array<i64: 2>, scalar_prefetch = 0 : i64, scratch_operands = 0 : i64, tpu.core_type = #tpu.core_type<tc>, window_params = [{transform_indices = @transform_0, window_bounds = array<i64: 2, 512>}, {pipeline_mode = #tpu.pipeline_mode<synchronous>, transform_indices = @transform_1, window_bounds = array<i64: 65, 2>}, {pipeline_mode = #tpu.pipeline_mode<synchronous>, transform_indices = @transform_2, window_bounds = array<i64: 65, 1>}, {pipeline_mode = #tpu.pipeline_mode<synchronous>, transform_indices = @transform_3, window_bounds = array<i64: 33, 32>}, {pipeline_mode = #tpu.pipeline_mode<synchronous>, transform_indices = @transform_4, window_bounds = array<i64: 33, 1>}, {pipeline_mode = #tpu.pipeline_mode<synchronous>, transform_indices = @transform_5, window_bounds = array<i64: 1, 32>}, {transform_indices = @transform_6, window_bounds = array<i64: 1, 512>}]} {
    %c0 = arith.constant 0 : index
    %c0_0 = arith.constant 0 : index
    %0 = vector.load %arg1[%c0, %c0_0] : memref<2x512xf32, #tpu.memory_space<vmem>>, vector<2x512xf32>
    %c0_1 = arith.constant 0 : index
    %c0_2 = arith.constant 0 : index
    %1 = vector.load %arg2[%c0_1, %c0_2] : memref<65x2xf32, #tpu.memory_space<vmem>>, vector<65x2xf32>
    %c0_3 = arith.constant 0 : index
    %c0_4 = arith.constant 0 : index
    %2 = vector.load %arg3[%c0_3, %c0_4] : memref<65x1xf32, #tpu.memory_space<vmem>>, vector<65x1xf32>
    %3 = vector.extract_strided_slice %1 {offsets = [0, 0], sizes = [65, 1], strides = [1, 1]} : vector<65x2xf32> to vector<65x1xf32>
    %4 = vector.extract_strided_slice %0 {offsets = [0, 0], sizes = [1, 512], strides = [1, 1]} : vector<2x512xf32> to vector<1x512xf32>
    %5 = vector.broadcast %3 : vector<65x1xf32> to vector<65x512xf32>
    %6 = vector.broadcast %4 : vector<1x512xf32> to vector<65x512xf32>
    %7 = arith.mulf %5, %6 : vector<65x512xf32>
    %8 = vector.extract_strided_slice %1 {offsets = [0, 1], sizes = [65, 1], strides = [1, 1]} : vector<65x2xf32> to vector<65x1xf32>
    %9 = vector.extract_strided_slice %0 {offsets = [1, 0], sizes = [1, 512], strides = [1, 1]} : vector<2x512xf32> to vector<1x512xf32>
    %10 = vector.broadcast %8 : vector<65x1xf32> to vector<65x512xf32>
    %11 = vector.broadcast %9 : vector<1x512xf32> to vector<65x512xf32>
    %12 = arith.mulf %10, %11 : vector<65x512xf32>
    %13 = arith.addf %7, %12 : vector<65x512xf32>
    %14 = vector.broadcast %2 : vector<65x1xf32> to vector<65x512xf32>
    %15 = arith.addf %13, %14 : vector<65x512xf32>
    %16 = vector.extract_strided_slice %15 {offsets = [0, 0], sizes = [32, 512], strides = [1, 1]} : vector<65x512xf32> to vector<32x512xf32>
    %17 = math.tanh %16 : vector<32x512xf32>
    %c0_5 = arith.constant 0 : index
    %c0_6 = arith.constant 0 : index
    %18 = vector.load %arg4[%c0_5, %c0_6] : memref<33x32xf32, #tpu.memory_space<vmem>>, vector<33x32xf32>
    %cst = arith.constant dense<0.000000e+00> : vector<33x512xf32>
    %19 = tpu.matmul %18, %17, %cst {dimension_numbers = #tpu.dot_dimension_numbers<[1], [0], [0], [1], [0, 0, 1, 1], [], []>} : vector<33x32xf32>, vector<32x512xf32>, vector<33x512xf32> -> vector<33x512xf32>
    %c0_7 = arith.constant 0 : index
    %c0_8 = arith.constant 0 : index
    %20 = vector.load %arg5[%c0_7, %c0_8] : memref<33x1xf32, #tpu.memory_space<vmem>>, vector<33x1xf32>
    %21 = vector.broadcast %20 : vector<33x1xf32> to vector<33x512xf32>
    %22 = arith.addf %19, %21 : vector<33x512xf32>
    %23 = vector.extract_strided_slice %15 {offsets = [32, 0], sizes = [32, 512], strides = [1, 1]} : vector<65x512xf32> to vector<32x512xf32>
    %24 = vector.extract_strided_slice %22 {offsets = [0, 0], sizes = [32, 512], strides = [1, 1]} : vector<33x512xf32> to vector<32x512xf32>
    %25 = arith.addf %23, %24 : vector<32x512xf32>
    %26 = math.tanh %25 : vector<32x512xf32>
    %27 = vector.extract_strided_slice %15 {offsets = [64, 0], sizes = [1, 512], strides = [1, 1]} : vector<65x512xf32> to vector<1x512xf32>
    %28 = vector.extract_strided_slice %22 {offsets = [32, 0], sizes = [1, 512], strides = [1, 1]} : vector<33x512xf32> to vector<1x512xf32>
    %29 = arith.addf %27, %28 : vector<1x512xf32>
    %c0_9 = arith.constant 0 : index
    %c0_10 = arith.constant 0 : index
    %30 = vector.load %arg6[%c0_9, %c0_10] : memref<1x32xf32, #tpu.memory_space<vmem>>, vector<1x32xf32>
    %cst_11 = arith.constant dense<0.000000e+00> : vector<1x512xf32>
    %31 = tpu.matmul %30, %26, %cst_11 {dimension_numbers = #tpu.dot_dimension_numbers<[1], [0], [0], [1], [0, 0, 1, 1], [], []>} : vector<1x32xf32>, vector<32x512xf32>, vector<1x512xf32> -> vector<1x512xf32>
    %32 = arith.addf %29, %31 : vector<1x512xf32>
    %cst_12 = arith.constant 5.000000e-01 : f32
    %33 = vector.broadcast %cst_12 : f32 to vector<1x512xf32>
    %34 = arith.mulf %33, %32 : vector<1x512xf32>
    %35 = math.tanh %34 : vector<1x512xf32>
    %cst_13 = arith.constant 1.000000e+00 : f32
    %36 = vector.broadcast %cst_13 : f32 to vector<1x512xf32>
    %37 = arith.addf %36, %35 : vector<1x512xf32>
    %cst_14 = arith.constant 5.000000e-01 : f32
    %38 = vector.broadcast %cst_14 : f32 to vector<1x512xf32>
    %39 = arith.mulf %38, %37 : vector<1x512xf32>
    %c0_15 = arith.constant 0 : index
    %c0_16 = arith.constant 0 : index
    %40 = vector.load %arg7[%c0_15, %c0_16] : memref<1x512xf32, #tpu.memory_space<vmem>>, vector<1x512xf32>
    tpu.vector_store %arg7[%c0_15, %c0_16], %39 {strides = array<i32>} : memref<1x512xf32, #tpu.memory_space<vmem>>, vector<1x512xf32>,
    return
  }
  func.func @transform_0(%arg0: i32) -> (i32, i32) {
    %c0_i32 = arith.constant 0 : i32
    %c0_i32_0 = arith.constant 0 : i32
    return %c0_i32, %arg0 : i32, i32
  }
  func.func @transform_1(%arg0: i32) -> (i32, i32) {
    %c0_i32 = arith.constant 0 : i32
    %c0_i32_0 = arith.constant 0 : i32
    %c0_i32_1 = arith.constant 0 : i32
    return %c0_i32, %c0_i32_0 : i32, i32
  }
  func.func @transform_2(%arg0: i32) -> (i32, i32) {
    %c0_i32 = arith.constant 0 : i32
    %c0_i32_0 = arith.constant 0 : i32
    %c0_i32_1 = arith.constant 0 : i32
    return %c0_i32, %c0_i32_0 : i32, i32
  }
  func.func @transform_3(%arg0: i32) -> (i32, i32) {
    %c0_i32 = arith.constant 0 : i32
    %c0_i32_0 = arith.constant 0 : i32
    %c0_i32_1 = arith.constant 0 : i32
    return %c0_i32, %c0_i32_0 : i32, i32
  }
  func.func @transform_4(%arg0: i32) -> (i32, i32) {
    %c0_i32 = arith.constant 0 : i32
    %c0_i32_0 = arith.constant 0 : i32
    %c0_i32_1 = arith.constant 0 : i32
    return %c0_i32, %c0_i32_0 : i32, i32
  }
  func.func @transform_5(%arg0: i32) -> (i32, i32) {
    %c0_i32 = arith.constant 0 : i32
    %c0_i32_0 = arith.constant 0 : i32
    %c0_i32_1 = arith.constant 0 : i32
    return %c0_i32, %c0_i32_0 : i32, i32
  }
  func.func @transform_6(%arg0: i32) -> (i32, i32) {
    %c0_i32 = arith.constant 0 : i32
    %c0_i32_0 = arith.constant 0 : i32
    return %c0_i32, %arg0 : i32, i32
  }
}

</mosaic_0001>

<bundles_post_ra>
// kernel: tpu_custom_call.1
= control target key start
LH: loop header
LB: loop body
LE: loop exit
PB: predicated region body
PF: predicated region fallthrough
CT: control target
= control target key end

     0   :  { %11 = vsyncpa [#allocation3], 0  ;;  %s1813_s0 = inlined_call_operand.vmem [shape: f32[2,1024], index: 0, kind: input, shape index: {}]   ;;  %s1814_s1 = inlined_call_operand.vmem [shape: f32[65,2], index: 1, kind: input, shape index: {}]   ;;  %s1815_s2 = inlined_call_operand.vmem [shape: f32[65,1], index: 2, kind: input, shape index: {}]   ;;  %s1816_s3 = inlined_call_operand.vmem [shape: f32[33,32], index: 3, kind: input, shape index: {}]   ;;  %s1817_s4 = inlined_call_operand.vmem [shape: f32[33,1], index: 4, kind: input, shape index: {}]   ;;  %s1818_s5 = inlined_call_operand.vmem [shape: f32[1,32], index: 5, kind: input, shape index: {}]   ;;  %s1819_s6 = inlined_call_operand.hbm [shape: f32[1,1024], index: 6, kind: output, shape index: {}]  }
   0x1   :  { %13 = vsyncpa [#allocation3 + $0x1], 0  ;;  %s1484_s21 = smov 0   ;;  %s1486_s22 = smov 0  }
   0x2   :  { %s1488_s23 = smov 0   ;;  %s1490_s24 = smov 0  }
   0x3 LB: > { %s1505_s25 = sadd.s32 4294967295, %s1442_s24   ;;  %s1182_s26 = sadd.s32 4294967294, %s1442_s24   ;;  %s1442_s24 = sphi %s1490_s24, %s1825_s24   ;;  %s1438_s23 = sphi %s1488_s23, %s1824_s23   ;;  %s1434_s22 = sphi %s1486_s22, %s1823_s22   ;;  %s1430_s21 = sphi %s1484_s21, %s1822_s21  }
   0x4   : > { %s1509_s27 = sadd.s32 1, %s1442_s24   ;;  %s157_s28 = sadd.s32 1, %s1438_s23 }
   0x5   : > { %s154_s29 = ssub.s32 %s1442_s24, %s1509_s27  ;;  %p167_p0 = scmp.ne.s32.totalorder %s1438_s23, %s1434_s22 }
   0x6   : > { %p155_p1 = scmp.eq.s32.totalorder %s154_s29, 0  ;;  %p168_p2 = scmp.eq.s32.totalorder %s1505_s25, 1 }
   0x7   : > { %p173_p3 = scmp.ne.s32.totalorder %s1434_s22, %s1430_s21  ;;  %p174_p4 = scmp.eq.s32.totalorder %s1182_s26, 1 }
   0x8   : > { %s1520_s30 = scalar_select %p155_p1, %s1438_s23, %s157_s28  }
   0x9   : > { %p1522_p5 = por %p168_p2, %p167_p0  ;;  %p1526_p6 = por %p174_p4, %p173_p3 }
   0xa   : > { %p1185_p7 = scmp.ge.s32.totalorder %s1442_s24, 1  ;;  %p216_p8 = scmp.lt.s32.totalorder %s1442_s24, 3 }
   0xc   : > { %p217_p9 = pnand %p1185_p7, %p216_p8 }
   0xd   : > { %v256_v0 = vld [vmem:[%s1814_s1 + $0x10] sm:$0xff] (!%p217_p9)  ;;  %v254_v1 = vld [vmem:[%s1814_s1] sm:$0xff] (!%p217_p9)  ;;  %v1444_v2 = vmov (!%p217_p9), 1   ;;  %v255_v3 = vld [vmem:[%s1814_s1 + $0x8] sm:$0xff] (!%p217_p9)  ;;  %v1445_v4 = vmov (!%p217_p9), 0   ;;  %v1446_v13 = vmov (!%p217_p9), 0.0   ;;  %v318_v26 = vlaneseq (!%p217_p9) }
   0xe   : > { %220 = sbr.rel (%p217_p9) target bundleno = 694 (0x2b6), region = 44  ;;  %1296 = vset.pattern.permute.xlu0 (!%p217_p9), %v1444_v2  ;;  %1294 = vset.pattern.permute.xlu1 (!%p217_p9), %v1444_v2  ;;  %v257_v5 = vld [vmem:[%s1814_s1 + $0x18] sm:$0xff] (!%p217_p9)  ;;  %v264_v6 = vld [vmem:[%s1815_s2 + $0x8] sm:$0xff] (!%p217_p9)  ;;  %v263_v7 = vld [vmem:[%s1815_s2] sm:$0xff] (!%p217_p9)  ;;  %s1187_s10 = sshll.u32 (!%p217_p9), %s1505_s25, 2  ;;  %vm666_vm0 = vcmask (!%p217_p9), 261120  }
   0xf   : > { %399 = vperm.xlu0 (!%p217_p9), %1296, %v256_v0   ;;  %391 = vperm.xlu1 (!%p217_p9), %1294, %v254_v1   ;;  %v265_v8 = vld [vmem:[%s1815_s2 + $0x10] sm:$0xff] (!%p217_p9)  ;;  %v266_v9 = vld [vmem:[%s1815_s2 + $0x18] sm:$0xff] (!%p217_p9)  ;;  %v259_v10 = vld [vmem:[%s1814_s1 + $0x28] sm:$0xff] (!%p217_p9)  ;;  %p247_p10 = scmp.lt.s32.totalorder (!%p217_p9), %s1187_s10, 7  ;;  %v1605_v27 = vshrl.u32 (!%p217_p9), %v318_v26, 7  ;;  %s243_s12 = sand.u32 (!%p217_p9), 1, %s1434_s22  }
  0x10   : > { %v260_v11 = vld [vmem:[%s1814_s1 + $0x30] sm:$0xff] (!%p217_p9)  ;;  %v261_v12 = vld [vmem:[%s1814_s1 + $0x38] sm:$0xff] (!%p217_p9)  ;;  %746 = vmatprep.mubr.f32.mxu0 (!%p217_p9), %v1446_v13  ;;  %841 = vmatprep.mubr.f32.mxu1 (!%p217_p9), %v1446_v13  ;;  %v268_v14 = vld [vmem:[%s1815_s2 + $0x28] sm:$0xff] (!%p217_p9)  ;;  %s1186_s13 = sshll.u32 (!%p217_p9), %s243_s12, 2  ;;  %vm1105_vm1 = vcmp.lt.s32.totalorder (!%p217_p9), %v318_v26, 512  ;;  %s1109_s20 = scalar_lea.sflag (!%p217_p9), [#allocation3], %s243_s12 }
  0x11   : > { %v258_v15 = vld [vmem:[%s1814_s1 + $0x20] sm:$0xff] (!%p217_p9)  ;;  %v637_v16 = vld [vmem:[%s1817_s4 + $0x8] sm:$0xff] (!%p217_p9)  ;;  %v270_v17 = vld [vmem:[%s1815_s2 + $0x38] sm:$0xff] (!%p217_p9)  ;;  %v428_v28 = vsub.s32 (!%p217_p9), 1, %v1605_v27  ;;  %v432_v29 = vsub.s32 (!%p217_p9), 3, %v1605_v27  ;;  %v436_v30 = vsub.s32 (!%p217_p9), 5, %v1605_v27 }
  0x12   : > { %v639_v18 = vld [vmem:[%s1817_s4 + $0x18] sm:$0xff] (!%p217_p9)  ;;  %v267_v19 = vld [vmem:[%s1815_s2 + $0x20] sm:$0xff] (!%p217_p9)  ;;  %v269_v23 = vld [vmem:[%s1815_s2 + $0x30] sm:$0xff] (!%p217_p9)  ;;  %v440_v34 = vsub.s32 (!%p217_p9), 7, %v1605_v27  ;;  %v320_v35 = vsub.s32 (!%p217_p9), 0, %v1605_v27  ;;  %v324_v36 = vsub.s32 (!%p217_p9), 2, %v1605_v27 }
  0x13   : > { %1297 = vset.pattern.permute.xlu0 (!%p217_p9), %v1445_v4  ;;  %395 = vperm.xlu1 (!%p217_p9), %1294, %v255_v3   ;;  %v262_v20 = vld [vmem:[%s1814_s1 + $0x40] sm:$0x1] (!%p217_p9)  ;;  %v638_v24 = vld [vmem:[%s1817_s4 + $0x10] sm:$0xff] (!%p217_p9)  ;;  %v328_v37 = vsub.s32 (!%p217_p9), 4, %v1605_v27  ;;  %v332_v40 = vsub.s32 (!%p217_p9), 6, %v1605_v27  ;;  %s245_s15 = scalar_lea.vmem (!%p217_p9), [#allocation2], %s1186_s13 }
  0x14   : > { %274 = vperm.xlu0 (!%p217_p9), %1297, %v254_v1   ;;  %v636_v21 = vld [vmem:[%s1817_s4] sm:$0xff] (!%p217_p9)  ;;  %s1123_s16 = sshll.u32 (!%p217_p9), %s245_s15, 4  ;;  %s1773_s16 = int_to_ptr.vmem [resolvable:$true] %s1123_s16 }
  0x15   : > { %v640_v22 = vld [vmem:[%s1817_s4 + $0x20] sm:$0x1]  ;;  %s1827_s10 = smov (!%p247_p10, %s1187_s10), 7  ;;  %s1380_s26 = scalar_lea.vmem %s1773_s16, 64 }
  0x16   : > { %v271_v25 = vld [vmem:[%s1815_s2 + $0x40] sm:$0x1]  ;;  %s1188_s11 = sshll.u32 %s1827_s10, 1  ;;  %p1381_p11 = scmp.ne.s32.totalorder %s1773_s16, %s1380_s26 }
  0x17   : > { %1295 = vset.pattern.permute.xlu1 %v1445_v4  ;;  %s250_s14 = scalar_lea.vmem %s1813_s0, %s1188_s11 }
  0x18   : > { %279 = vperm.xlu0 %1297, %v255_v3   ;;  %289 = vperm.xlu1 %1295, %v257_v5   ;;  %v253_v32 = vld [vmem:[%s250_s14] sm:$0xff]  ;;  %s1206_s14 = sshll.u32 %s1505_s25, 6  ;;  %p1382_p12 = pnand %p1381_p11, %p1522_p5 }
  0x19   : > { %v429_v38 = vrot.slane %v253_v32, %v428_v28  ;;  %v433_v39 = vrot.slane %v253_v32, %v432_v29  ;;  %v437_v41 = vrot.slane %v253_v32, %v436_v30  ;;  %v441_v43 = vrot.slane %v253_v32, %v440_v34  ;;  %s1771_s19 = scalar_lea.hbm %s1819_s6, %s1206_s14  ;;  %s1448_s25 = smov [#allocation2]  }
  0x1a   : > { %v321_v45 = vrot.slane %v253_v32, %v320_v35  ;;  %v325_v46 = vrot.slane %v253_v32, %v324_v36  ;;  %v329_v47 = vrot.slane %v253_v32, %v328_v37  ;;  %v333_v50 = vrot.slane %v253_v32, %v332_v40  ;;  %p1383_p13 = pneg %p1382_p12  ;;  %s1384_s28 = sshll.u32 %s1448_s25, 4  ;;  %s1385_s28 = int_to_ptr.vmem [resolvable:$false] %s1384_s28 }
  0x1b   : > { %v1618_v48 = vrot.slane %v429_v38, %v428_v28  ;;  %v1620_v49 = vrot.slane %v433_v39, %v428_v28  ;;  %v1622_v51 = vrot.slane %v437_v41, %v428_v28  ;;  %v1624_v52 = vrot.slane %v441_v43, %v428_v28  ;;  %s1386_s29 = scalar_lea.vmem %s1385_s28, 128  ;;  %p1387_p0 = scmp.lt.s32.totalorder %s1773_s16, %s1385_s28 }
  0x1c   : > { %284 = vperm.xlu0 %1297, %v256_v0   ;;  %1298 = vset.pattern.permute.xlu1 %v1444_v2  ;;  %v1626_v53 = vrot.slane %v321_v45, %v320_v35  ;;  %v1628_v54 = vrot.slane %v325_v46, %v320_v35  ;;  %v1632_v57 = vrot.slane %v329_v47, %v320_v35  ;;  %p1388_p1 = scmp.lt.s32.totalorder %s1386_s29, %s1380_s26 }
  0x1d   : > { %403 = vperm.xlu1 %1298, %v257_v5   ;;  %v1636_v60 = vrot.slane %v333_v50, %v320_v35 }
  0x1e   : > { %p1389_p2 = por %p1388_p1, %p1387_p0 }
  0x20   : > { %541 = vperm.xlu0 %1297, %v264_v6   ;;  %p1390_p3 = pnand %p1389_p2, %p1383_p13 }
  0x21   : > { %1299 = vset.pattern.permute.xlu1 %v1445_v4 }
  0x22   : > { %536 = vperm.xlu1 %1299, %v263_v7  }
  0x24   : > { %1300 = vset.pattern.permute.xlu0 %v1444_v2 }
  0x25   : > { %407 = vperm.xlu0 %1300, %v258_v15  }
  0x26   : > { %546 = vperm.xlu1 %1299, %v265_v8  }
  0x29   : > { %1301 = vset.pattern.permute.xlu0 %v1445_v4 }
  0x2a   : > { %551 = vperm.xlu1 %1299, %v266_v9   ;;  %294 = vperm.xlu0 %1301, %v258_v15  }
  0x2e   : > { %299 = vperm.xlu1 %1299, %v259_v10   ;;  %309 = vperm.xlu0 %1301, %v261_v12  }
  0x32   : > { %1302 = vset.pattern.permute.xlu1 %v1444_v2  ;;  %556 = vperm.xlu0 %1301, %v267_v19  }
  0x33   : > { %411 = vperm.xlu1 %1302, %v259_v10  }
  0x36   : > { %643 = vperm.xlu0 %1301, %v636_v21  }
  0x37   : > { %1303 = vset.pattern.permute.xlu1 %v1445_v4 }
  0x38   : > { %304 = vperm.xlu1 %1303, %v260_v11  }
  0x3a   : > { %566 = vperm.xlu0 %1301, %v269_v23  }
  0x3c   : > { %1304 = vset.pattern.permute.xlu1 %v1444_v2 }
  0x3d   : > { %415 = vperm.xlu1 %1304, %v260_v11  }
  0x3e   : > { %653 = vperm.xlu0 %1301, %v638_v24  }
  0x41   : > { %419 = vperm.xlu1 %1304, %v261_v12  }
  0x42   : > { %314 = vperm.xlu0 %1301, %v262_v20  }
  0x45   : > { %1305 = vset.pattern.permute.xlu1 %v1445_v4 }
  0x46   : > { %561 = vperm.xlu1 %1305, %v268_v14   ;;  %576 = vperm.xlu0 %1301, %v271_v25  }
  0x4a   : > { %648 = vperm.xlu1 %1305, %v637_v16  }
  0x4e   : > { %571 = vperm.xlu1 %1305, %v270_v17  }
  0x52   : > { %658 = vperm.xlu1 %1305, %v639_v18  }
  0x56   : > { %1306 = vset.pattern.permute.xlu1 %v1444_v2 }
  0x57   : > { %423 = vperm.xlu1 %1306, %v262_v20  }
  0x5b   : > { %1307 = vset.pattern.permute.xlu1 %v1445_v4 }
  0x5c   : > { %663 = vperm.xlu1 %1307, %v640_v22  }
  0x8e   : > { %v392_v31 = vpop.permute.xlu1 %391  ;;  %v400_v33 = vpop.permute.xlu0 %399 }
  0x8f   : > { %v462_v58 = vmul.f32 %v1618_v48, %v392_v31  ;;  %v463_v59 = vmul.f32 %v1620_v49, %v392_v31  ;;  %v464_v61 = vmul.f32 %v1622_v51, %v392_v31  ;;  %v465_v1 = vmul.f32 %v1624_v52, %v392_v31 }
  0x90   : > { %v470_v6 = vmul.f32 %v1618_v48, %v400_v33  ;;  %v471_v11 = vmul.f32 %v1620_v49, %v400_v33  ;;  %v472_v16 = vmul.f32 %v1622_v51, %v400_v33  ;;  %v473_v20 = vmul.f32 %v1624_v52, %v400_v33 }
  0x92   : > { %v396_v42 = vpop.permute.xlu1 %395 }
  0x93   : > { %v275_v44 = vpop.permute.xlu0 %274  ;;  %v466_v7 = vmul.f32 %v1618_v48, %v396_v42  ;;  %v467_v8 = vmul.f32 %v1620_v49, %v396_v42  ;;  %v468_v9 = vmul.f32 %v1622_v51, %v396_v42  ;;  %v469_v12 = vmul.f32 %v1624_v52, %v396_v42 }
  0x94   : > { %v354_v2 = vmul.f32 %v1626_v53, %v275_v44  ;;  %v355_v3 = vmul.f32 %v1628_v54, %v275_v44  ;;  %v356_v14 = vmul.f32 %v1632_v57, %v275_v44  ;;  %v357_v15 = vmul.f32 %v1636_v60, %v275_v44 }
  0x96   : > { %v498_v23 = vadd.f32 %v462_v58, %v354_v2  ;;  %v499_v24 = vadd.f32 %v463_v59, %v355_v3  ;;  %v500_v35 = vadd.f32 %v464_v61, %v356_v14  ;;  %v501_v36 = vadd.f32 %v465_v1, %v357_v15 }
  0x97   : > { %v280_v55 = vpop.permute.xlu0 %279  ;;  %v1630_v56 = vpop.permute.xlu1 %289 }
  0x98   : > { %v358_v62 = vmul.f32 %v1626_v53, %v280_v55  ;;  %v359_v63 = vmul.f32 %v1628_v54, %v280_v55  ;;  %v360_v0 = vmul.f32 %v1632_v57, %v280_v55  ;;  %v361_v4 = vmul.f32 %v1636_v60, %v280_v55 }
  0x99   : > { %v366_v37 = vmul.f32 %v1626_v53, %v1630_v56  ;;  %v367_v39 = vmul.f32 %v1628_v54, %v1630_v56  ;;  %v369_v3 = vmul.f32 %v1636_v60, %v1630_v56 }
  0x9a   : > { %v502_v17 = vadd.f32 %v466_v7, %v358_v62  ;;  %v503_v18 = vadd.f32 %v467_v8, %v359_v63  ;;  %v504_v19 = vadd.f32 %v468_v9, %v360_v0  ;;  %v505_v22 = vadd.f32 %v469_v12, %v361_v4 }
  0x9b   : > { %v285_v5 = vpop.permute.xlu0 %284  ;;  %v368_v0 = vmul.f32 %v1632_v57, %v1630_v56 }
  0x9c   : > { %v404_v10 = vpop.permute.xlu1 %403  ;;  %v362_v25 = vmul.f32 %v1626_v53, %v285_v5  ;;  %v363_v31 = vmul.f32 %v1628_v54, %v285_v5  ;;  %v364_v33 = vmul.f32 %v1632_v57, %v285_v5  ;;  %v365_v40 = vmul.f32 %v1636_v60, %v285_v5 }
  0x9d   : > { %v474_v42 = vmul.f32 %v1618_v48, %v404_v10  ;;  %v475_v45 = vmul.f32 %v1620_v49, %v404_v10  ;;  %v476_v55 = vmul.f32 %v1622_v51, %v404_v10  ;;  %v477_v61 = vmul.f32 %v1624_v52, %v404_v10 }
  0x9e   : > { %v506_v44 = vadd.f32 %v470_v6, %v362_v25  ;;  %v507_v50 = vadd.f32 %v471_v11, %v363_v31  ;;  %v508_v58 = vadd.f32 %v472_v16, %v364_v33  ;;  %v509_v62 = vadd.f32 %v473_v20, %v365_v40  ;;  %v632_v40 = vld [vmem:[%s1816_s3 + $0x8] sm:$0xff] }
  0x9f   : > { %v542_v21 = vpop.permute.xlu0 %541  ;;  %v510_v2 = vadd.f32 %v474_v42, %v366_v37  ;;  %v511_v6 = vadd.f32 %v475_v45, %v367_v39  ;;  %v512_v7 = vadd.f32 %v476_v55, %v368_v0  ;;  %v513_v9 = vadd.f32 %v477_v61, %v369_v3  ;;  %v631_v39 = vld [vmem:[%s1816_s3] sm:$0xff]  ;;  %v634_v42 = vld [vmem:[%s1816_s3 + $0x18] sm:$0xff] }
  0xa0   : > { %v583_v28 = vadd.f32 %v542_v21, %v502_v17  ;;  %v584_v29 = vadd.f32 %v542_v21, %v503_v18  ;;  %v585_v30 = vadd.f32 %v542_v21, %v504_v19  ;;  %v586_v32 = vadd.f32 %v542_v21, %v505_v22 }
  0xa1   : > { %v537_v34 = vpop.permute.xlu1 %536 }
  0xa2   : > { %1308 = vtanh.f32 %v583_v28  ;;  %v579_v38 = vadd.f32 %v537_v34, %v498_v23  ;;  %v580_v41 = vadd.f32 %v537_v34, %v499_v24  ;;  %v581_v43 = vadd.f32 %v537_v34, %v500_v35 }
  0xa3   : > { %1310 = vtanh.f32 %v584_v29  ;;  %v582_v46 = vadd.f32 %v537_v34, %v501_v36 }
  0xa4   : > { %1312 = vtanh.f32 %v585_v30  ;;  %v408_v45 = vpop.permute.xlu0 %407 }
  0xa5   : > { %1314 = vtanh.f32 %v586_v32  ;;  %v547_v47 = vpop.permute.xlu1 %546 }
  0xa6   : > { %1316 = vtanh.f32 %v579_v38  ;;  %v587_v59 = vadd.f32 %v547_v47, %v506_v44  ;;  %v588_v63 = vadd.f32 %v547_v47, %v507_v50  ;;  %v589_v1 = vadd.f32 %v547_v47, %v508_v58 }
  0xa7   : > { %1318 = vtanh.f32 %v580_v41  ;;  %v590_v4 = vadd.f32 %v547_v47, %v509_v62  ;;  %v633_v41 = vld [vmem:[%s1816_s3 + $0x10] sm:$0xff] }
  0xa8   : > { %1320 = vtanh.f32 %v581_v43  ;;  %v635_v43 = vld [vmem:[%s1816_s3 + $0x20] sm:$0x1] }
  0xa9   : > { %1322 = vtanh.f32 %v582_v46  ;;  %v552_v5 = vpop.permute.xlu1 %551  ;;  %v295_v50 = vpop.permute.xlu0 %294 }
  0xaa   : > { %1324 = vtanh.f32 %v587_v59  ;;  %v591_v8 = vadd.f32 %v552_v5, %v510_v2  ;;  %v592_v10 = vadd.f32 %v552_v5, %v511_v6  ;;  %v593_v12 = vadd.f32 %v552_v5, %v512_v7 }
  0xab   : > { %1326 = vtanh.f32 %v588_v63  ;;  %v594_v15 = vadd.f32 %v552_v5, %v513_v9  ;;  %v478_v7 = vmul.f32 %v1618_v48, %v408_v45 }
  0xac   : > { %v1309_v11 = vpop.eup %1308  ;;  %1328 = vtanh.f32 %v589_v1 }
  0xad   : > { %v1311_v14 = vpop.eup %1310  ;;  %1330 = vtanh.f32 %v590_v4  ;;  %v300_v44 = vpop.permute.xlu1 %299 }
  0xae   : > { %v1313_v16 = vpop.eup %1312  ;;  %1332 = vtanh.f32 %v591_v8  ;;  %v310_v58 = vpop.permute.xlu0 %309  ;;  %v374_v0 = vmul.f32 %v1626_v53, %v300_v44  ;;  %v376_v1 = vmul.f32 %v1632_v57, %v300_v44  ;;  %v375_v3 = vmul.f32 %v1628_v54, %v300_v44 }
  0xaf   : > { %v1315_v17 = vpop.eup %1314  ;;  %1334 = vtanh.f32 %v592_v10  ;;  %v377_v4 = vmul.f32 %v1636_v60, %v300_v44  ;;  %v370_v8 = vmul.f32 %v1626_v53, %v295_v50 }
  0xb0   : > { %v1317_v56 = vpop.eup %1316  ;;  %1336 = vtanh.f32 %v593_v12 }
  0xb1   : > { %v1319_v18 = vpop.eup %1318  ;;  %1338 = vtanh.f32 %v594_v15  ;;  %v1209_v19 = vpack.c.bf16 %v1309_v11, %v1317_v56  ;;  %v371_v15 = vmul.f32 %v1628_v54, %v295_v50  ;;  %v480_v56 = vmul.f32 %v1622_v51, %v408_v45 }
  0xb2   : > { %v1321_v20 = vpop.eup %1320  ;;  %v1207_v21 = vpack.c.bf16 %v1311_v14, %v1319_v18  ;;  %v412_v46 = vpop.permute.xlu1 %411  ;;  %v479_v14 = vmul.f32 %v1620_v49, %v408_v45  ;;  %v372_v18 = vmul.f32 %v1632_v57, %v295_v50 }
  0xb3   : > { %v1323_v22 = vpop.eup %1322  ;;  %v1217_v25 = vpack.c.bf16 %v1313_v16, %v1321_v20  ;;  %v482_v59 = vmul.f32 %v1618_v48, %v412_v46  ;;  %v484_v61 = vmul.f32 %v1622_v51, %v412_v46  ;;  %v483_v62 = vmul.f32 %v1620_v49, %v412_v46  ;;  %v557_v2 = vpop.permute.xlu0 %556 }
  0xb4   : > { %v1325_v23 = vpop.eup %1324  ;;  %1208 = vmatprep.subr.bf16.mxu0 %v1207_v21  ;;  %v1215_v24 = vpack.c.bf16 %v1315_v17, %v1323_v22  ;;  %v485_v63 = vmul.f32 %v1624_v52, %v412_v46  ;;  %v481_v22 = vmul.f32 %v1624_v52, %v408_v45  ;;  %v384_v45 = vmul.f32 %v1632_v57, %v310_v58 }
  0xb5   : > { %v1327_v28 = vpop.eup %1326  ;;  %1210 = vmatpush1.bf16.msra.mxu0 %v1209_v19  ;;  %v518_v5 = vadd.f32 %v482_v59, %v374_v0  ;;  %v520_v6 = vadd.f32 %v484_v61, %v376_v1  ;;  %v519_v9 = vadd.f32 %v483_v62, %v375_v3  ;;  %v385_v59 = vmul.f32 %v1636_v60, %v310_v58 }
  0xb6   : > { %v1329_v29 = vpop.eup %1328  ;;  %1216 = vmatprep.subr.bf16.mxu1 %v1215_v24  ;;  %v521_v10 = vadd.f32 %v485_v63, %v377_v4 }
  0xb7   : > { %v1331_v30 = vpop.eup %1330  ;;  %1218 = vmatpush1.bf16.msra.mxu1 %v1217_v25  ;;  %v305_v47 = vpop.permute.xlu1 %304 }
  0xb8   : > { %v1333_v31 = vpop.eup %1332  ;;  %v378_v11 = vmul.f32 %v1626_v53, %v305_v47  ;;  %v379_v12 = vmul.f32 %v1628_v54, %v305_v47  ;;  %v380_v16 = vmul.f32 %v1632_v57, %v305_v47  ;;  %v381_v17 = vmul.f32 %v1636_v60, %v305_v47  ;;  %v644_v24 = vpop.permute.xlu0 %643 }
  0xb9   : > { %v1335_v32 = vpop.eup %1334  ;;  %v1213_v34 = vpack.c.bf16 %v1333_v31, %v1325_v23  ;;  %v373_v23 = vmul.f32 %v1636_v60, %v295_v50 }
  0xba   : > { %v1337_v35 = vpop.eup %1336  ;;  %v1211_v36 = vpack.c.bf16 %v1335_v32, %v1327_v28 }
  0xbb   : > { %v1339_v37 = vpop.eup %1338  ;;  %v1221_v33 = vpack.c.bf16 %v1337_v35, %v1329_v29  ;;  %v515_v35 = vadd.f32 %v479_v14, %v371_v15 }
  0xbc   : > { %1212 = vmatprep.subr.bf16.mxu0 %v1211_v36  ;;  %v1219_v38 = vpack.c.bf16 %v1339_v37, %v1331_v30  ;;  %v416_v55 = vpop.permute.xlu1 %415  ;;  %v514_v30 = vadd.f32 %v478_v7, %v370_v8  ;;  %v516_v36 = vadd.f32 %v480_v56, %v372_v18  ;;  %v567_v61 = vpop.permute.xlu0 %566 }
  0xbd   : > { %1214 = vmatpush1.bf16.msra.mxu0 %v1213_v34  ;;  %v486_v19 = vmul.f32 %v1618_v48, %v416_v55  ;;  %v487_v20 = vmul.f32 %v1620_v49, %v416_v55  ;;  %v488_v25 = vmul.f32 %v1622_v51, %v416_v55  ;;  %v489_v28 = vmul.f32 %v1624_v52, %v416_v55 }
  0xbe   : > { %1220 = vmatprep.subr.bf16.mxu1 %v1219_v38  ;;  %v595_v46 = vadd.f32 %v557_v2, %v514_v30  ;;  %v596_v63 = vadd.f32 %v557_v2, %v515_v35  ;;  %v597_v3 = vadd.f32 %v557_v2, %v516_v36 }
  0xbf   : > { %1222 = vmatpush1.bf16.msra.mxu1 %v1221_v33  ;;  %v522_v55 = vadd.f32 %v486_v19, %v378_v11  ;;  %v524_v1 = vadd.f32 %v488_v25, %v380_v16  ;;  %v525_v14 = vadd.f32 %v489_v28, %v381_v17 }
  0xc0   : > { %1189 = vmatmul.mubr.msk.f32.vlgmr.msra.gmra.mrb[0].mxu0 %vm666_vm0, %v631_v39 }
  0xc1   : > { %752 = vmatprep.mubr.f32.mxu0 %v1446_v13  ;;  %v606_v30 = vadd.f32 %v567_v61, %v525_v14 }
  0xc2   : > { %1194 = vmatmul.mubr.msk.f32.vlgmr.msra.gmra.mrb[0].mxu1 %vm666_vm0, %v631_v39  ;;  %v382_v39 = vmul.f32 %v1626_v53, %v310_v58 }
  0xc3   : > { %847 = vmatprep.mubr.f32.mxu1 %v1446_v13 }
  0xc4   : > { %1190 = vmatmul.mubr.msk.f32.gmra.mrb[2].mxu0 %vm666_vm0, %v632_v40 }
  0xc5   : > { %758 = vmatprep.mubr.f32.mxu0 %v1446_v13 }
  0xc6   : > { %1195 = vmatmul.mubr.msk.f32.gmra.mrb[2].mxu1 %vm666_vm0, %v632_v40  ;;  %v383_v40 = vmul.f32 %v1628_v54, %v310_v58  ;;  %v603_v58 = vadd.f32 %v567_v61, %v522_v55 }
  0xc7   : > { %853 = vmatprep.mubr.f32.mxu1 %v1446_v13 }
  0xc8   : > { %1191 = vmatmul.mubr.msk.f32.gmra.mrb[4].mxu0 %vm666_vm0, %v633_v41 }
  0xc9   : > { %764 = vmatprep.mubr.f32.mxu0 %v1446_v13 }
  0xca   : > { %1196 = vmatmul.mubr.msk.f32.gmra.mrb[4].mxu1 %vm666_vm0, %v633_v41 }
  0xcb   : > { %859 = vmatprep.mubr.f32.mxu1 %v1446_v13 }
  0xcc   : > { %1192 = vmatmul.mubr.msk.f32.gmra.mrb[6].mxu0 %vm666_vm0, %v634_v42 }
  0xcd   : > { %770 = vmatprep.mubr.f32.mxu0 %v1446_v13 }
  0xce   : > { %1197 = vmatmul.mubr.msk.f32.gmra.mrb[6].mxu1 %vm666_vm0, %v634_v42 }
  0xcf   : > { %865 = vmatprep.mubr.f32.mxu1 %v1446_v13 }
  0xd0   : > { %1193 = vmatmul.mubr.msk.f32.gmra.mrb[8].mxu0 %vm666_vm0, %v635_v43 }
  0xd1   : > { %976 = vmatprep.mubr.f32.mxu0 %v1446_v13 }
  0xd2   : > { %1198 = vmatmul.mubr.msk.f32.gmra.mrb[8].mxu1 %vm666_vm0, %v635_v43  ;;  %v517_v43 = vadd.f32 %v481_v22, %v373_v23  ;;  %v605_v22 = vadd.f32 %v567_v61, %v524_v1 }
  0xd3   : > { %1047 = vmatprep.mubr.f32.mxu1 %v1446_v13  ;;  %v420_v13 = vpop.permute.xlu1 %419 }
  0xd4   : > { %v1732_v29 = vmul.f32 %v1618_v48, %v420_v13  ;;  %v1735_v31 = vmul.f32 %v1620_v49, %v420_v13  ;;  %v1738_v32 = vmul.f32 %v1622_v51, %v420_v13  ;;  %v1741_v34 = vmul.f32 %v1624_v52, %v420_v13 }
  0xd5   : > { %v598_v8 = vadd.f32 %v557_v2, %v517_v43  ;;  %v654_v2 = vpop.permute.xlu0 %653 }
  0xd6   : > { %v526_v43 = vadd.f32 %v1732_v29, %v382_v39  ;;  %v529_v1 = vadd.f32 %v1741_v34, %v385_v59 }
  0xd7   : > { %v562_v21 = vpop.permute.xlu1 %561 }
  0xd8   : > { %v599_v37 = vadd.f32 %v562_v21, %v518_v5  ;;  %v601_v33 = vadd.f32 %v562_v21, %v520_v6  ;;  %v600_v38 = vadd.f32 %v562_v21, %v519_v9  ;;  %v602_v44 = vadd.f32 %v562_v21, %v521_v10 }
  0xd9   : > { %v523_v6 = vadd.f32 %v487_v20, %v379_v12 }
  0xdb   : > { %v649_v41 = vpop.permute.xlu1 %648  ;;  %v604_v20 = vadd.f32 %v567_v61, %v523_v6 }
  0xdf   : > { %v572_v18 = vpop.permute.xlu1 %571 }
  0xe0   : > { %v607_v39 = vadd.f32 %v572_v18, %v526_v43  ;;  %v610_v34 = vadd.f32 %v572_v18, %v529_v1 }
 0x193   : > { %v748_v42 = vpop.f32.mrb[0].mxu0 }
 0x194   : > { %v749_v47 = vadd.f32 %v748_v42, %v644_v24  ;;  %v750_v50 = vpop.f32.mrb[1].mxu0 }
 0x195   : > { %v843_v62 = vpop.f32.mrb[0].mxu1  ;;  %v751_v0 = vadd.f32 %v750_v50, %v644_v24 }
 0x196   : > { %v872_v13 = vadd.f32 %v749_v47, %v595_v46  ;;  %v844_v4 = vadd.f32 %v843_v62, %v644_v24  ;;  %v845_v5 = vpop.f32.mrb[1].mxu1 }
 0x197   : > { %v873_v7 = vadd.f32 %v751_v0, %v596_v63  ;;  %v846_v9 = vadd.f32 %v845_v5, %v644_v24  ;;  %v754_v10 = vpop.f32.mrb[2].mxu0 }
 0x198   : > { %1340 = vtanh.f32 %v872_v13  ;;  %v874_v15 = vadd.f32 %v844_v4, %v597_v3  ;;  %v755_v11 = vadd.f32 %v754_v10, %v649_v41  ;;  %v756_v56 = vpop.f32.mrb[3].mxu0 }
 0x199   : > { %1342 = vtanh.f32 %v873_v7  ;;  %v875_v19 = vadd.f32 %v846_v9, %v598_v8  ;;  %v849_v21 = vpop.f32.mrb[2].mxu1  ;;  %v757_v16 = vadd.f32 %v756_v56, %v649_v41 }
 0x19a   : > { %1344 = vtanh.f32 %v874_v15  ;;  %v876_v23 = vadd.f32 %v755_v11, %v599_v37  ;;  %v850_v25 = vadd.f32 %v849_v21, %v649_v41  ;;  %v851_v12 = vpop.f32.mrb[3].mxu1  ;;  %v527_v37 = vadd.f32 %v1735_v31, %v383_v40 }
 0x19b   : > { %1346 = vtanh.f32 %v875_v19  ;;  %v877_v24 = vadd.f32 %v757_v16, %v600_v38  ;;  %v852_v17 = vadd.f32 %v851_v12, %v649_v41  ;;  %v760_v28 = vpop.f32.mrb[4].mxu0  ;;  %v528_v38 = vadd.f32 %v1738_v32, %v384_v45  ;;  %v659_v41 = vpop.permute.xlu1 %658 }
 0x19c   : > { %1348 = vtanh.f32 %v876_v23  ;;  %v878_v35 = vadd.f32 %v850_v25, %v601_v33  ;;  %v761_v36 = vadd.f32 %v760_v28, %v654_v2  ;;  %v762_v42 = vpop.f32.mrb[5].mxu0  ;;  %v608_v3 = vadd.f32 %v572_v18, %v527_v37 }
 0x19d   : > { %1350 = vtanh.f32 %v877_v24  ;;  %v879_v46 = vadd.f32 %v852_v17, %v602_v44  ;;  %v855_v47 = vpop.f32.mrb[4].mxu1  ;;  %v763_v50 = vadd.f32 %v762_v42, %v654_v2  ;;  %v609_v45 = vadd.f32 %v572_v18, %v528_v38 }
 0x19e   : > { %1352 = vtanh.f32 %v878_v35  ;;  %v880_v55 = vadd.f32 %v761_v36, %v603_v58  ;;  %v856_v62 = vadd.f32 %v855_v47, %v654_v2  ;;  %v857_v63 = vpop.f32.mrb[5].mxu1  ;;  %v315_v47 = vpop.permute.xlu0 %314 }
 0x19f   : > { %1354 = vtanh.f32 %v879_v46  ;;  %v881_v61 = vadd.f32 %v763_v50, %v604_v20  ;;  %v858_v33 = vadd.f32 %v857_v63, %v654_v2  ;;  %v766_v0 = vpop.f32.mrb[6].mxu0  ;;  %v908_v46 = vld [vmem:[%s1818_s5] sm:$0x1]  ;;  %v424_v50 = vpop.permute.xlu1 %423  ;;  %v386_v37 = vmul.f32 %v1626_v53, %v315_v47 }
 0x1a0   : > { %1356 = vtanh.f32 %v880_v55  ;;  %v882_v29 = vadd.f32 %v856_v62, %v605_v22  ;;  %v767_v44 = vadd.f32 %v766_v0, %v659_v41  ;;  %v768_v13 = vpop.f32.mrb[7].mxu0  ;;  %v494_v55 = vmul.f32 %v1618_v48, %v424_v50 }
 0x1a1   : > { %1358 = vtanh.f32 %v881_v61  ;;  %v883_v31 = vadd.f32 %v858_v33, %v606_v30  ;;  %v861_v40 = vpop.f32.mrb[6].mxu1  ;;  %v769_v4 = vadd.f32 %v768_v13, %v659_v41  ;;  %v387_v62 = vmul.f32 %v1628_v54, %v315_v47 }
 0x1a2   : > { %v1341_v5 = vpop.eup %1340  ;;  %1360 = vtanh.f32 %v882_v29  ;;  %v884_v32 = vadd.f32 %v767_v44, %v607_v39  ;;  %v862_v6 = vadd.f32 %v861_v40, %v659_v41  ;;  %v863_v7 = vpop.f32.mrb[7].mxu1  ;;  %v495_v63 = vmul.f32 %v1620_v49, %v424_v50 }
 0x1a3   : > { %v1343_v8 = vpop.eup %1342  ;;  %1362 = vtanh.f32 %v883_v31  ;;  %v885_v9 = vadd.f32 %v769_v4, %v608_v3  ;;  %v864_v59 = vadd.f32 %v863_v7, %v659_v41  ;;  %v388_v38 = vmul.f32 %v1632_v57, %v315_v47  ;;  %v577_v1 = vpop.permute.xlu0 %576 }
 0x1a4   : > { %v1345_v10 = vpop.eup %1344  ;;  %1364 = vtanh.f32 %v884_v32  ;;  %v886_v14 = vadd.f32 %v862_v6, %v609_v45  ;;  %v496_v41 = vmul.f32 %v1622_v51, %v424_v50  ;;  %v389_v61 = vmul.f32 %v1636_v60, %v315_v47  ;;  %v664_v48 = vpop.permute.xlu1 %663 }
 0x1a5   : > { %v1347_v15 = vpop.eup %1346  ;;  %1366 = vtanh.f32 %v885_v9  ;;  %v887_v11 = vadd.f32 %v864_v59, %v610_v34  ;;  %v497_v33 = vmul.f32 %v1624_v52, %v424_v50  ;;  %v530_v0 = vadd.f32 %v494_v55, %v386_v37 }
 0x1a6   : > { %v1349_v56 = vpop.eup %1348  ;;  %1368 = vtanh.f32 %v886_v14  ;;  %v531_v29 = vadd.f32 %v495_v63, %v387_v62  ;;  %v532_v39 = vadd.f32 %v496_v41, %v388_v38  ;;  %v1447_v59 = vmov 1966171168  }
 0x1a7   : > { %v1351_v58 = vpop.eup %1350  ;;  %1370 = vtanh.f32 %v887_v11  ;;  %v1225_v19 = vpack.c.bf16 %v1349_v56, %v1341_v5  ;;  %v533_v44 = vadd.f32 %v497_v33, %v389_v61  ;;  %v611_v53 = vadd.f32 %v577_v1, %v530_v0 }
 0x1a8   : > { %v1353_v21 = vpop.eup %1352  ;;  %v1223_v16 = vpack.c.bf16 %v1351_v58, %v1343_v8  ;;  %v612_v13 = vadd.f32 %v577_v1, %v531_v29  ;;  %v613_v31 = vadd.f32 %v577_v1, %v532_v39 }
 0x1a9   : > { %v1355_v22 = vpop.eup %1354  ;;  %v1233_v23 = vpack.c.bf16 %v1353_v21, %v1345_v10  ;;  %v614_v54 = vadd.f32 %v577_v1, %v533_v44  ;;  %v1239_v40 = vadd.f32 %v664_v48, %v611_v53  ;;  %v1081_v10 = vunpack.c.l.s4 %v1447_v59 }
 0x1aa   : > { %v1357_v25 = vpop.eup %1356  ;;  %1224 = vmatprep.subr.bf16.mxu0 %v1223_v16  ;;  %v1231_v12 = vpack.c.bf16 %v1355_v22, %v1347_v15  ;;  %v1241_v3 = vadd.f32 %v664_v48, %v612_v13  ;;  %v1243_v4 = vadd.f32 %v664_v48, %v613_v31 }
 0x1ab   : > { %v1359_v18 = vpop.eup %1358  ;;  %1226 = vmatpush1.bf16.msra.mxu0 %v1225_v19  ;;  %v1245_v32 = vadd.f32 %v664_v48, %v614_v54  ;;  %v1082_v15 = vunpack.c.0.s8 %v1081_v10 }
 0x1ac   : > { %v1361_v20 = vpop.eup %1360  ;;  %1232 = vmatprep.subr.bf16.mxu1 %v1231_v12 }
 0x1ad   : > { %v1363_v2 = vpop.eup %1362  ;;  %1234 = vmatpush1.bf16.msra.mxu1 %v1233_v23 }
 0x1ae   : > { %v1365_v24 = vpop.eup %1364 }
 0x1af   : > { %v1367_v17 = vpop.eup %1366  ;;  %v1229_v28 = vpack.c.bf16 %v1365_v24, %v1357_v25  ;;  %v1085_v25 = vsub.s32 %v1082_v15, %v1605_v27 }
 0x1b0   : > { %v1369_v30 = vpop.eup %1368  ;;  %v1227_v35 = vpack.c.bf16 %v1367_v17, %v1359_v18 }
 0x1b1   : > { %v1371_v36 = vpop.eup %1370  ;;  %v1237_v42 = vpack.c.bf16 %v1369_v30, %v1361_v20 }
 0x1b2   : > { %1228 = vmatprep.subr.bf16.mxu0 %v1227_v35  ;;  %v1235_v43 = vpack.c.bf16 %v1371_v36, %v1363_v2 }
 0x1b3   : > { %1230 = vmatpush1.bf16.msra.mxu0 %v1229_v28 }
 0x1b4   : > { %1236 = vmatprep.subr.bf16.mxu1 %v1235_v43 }
 0x1b5   : > { %1238 = vmatpush1.bf16.msra.mxu1 %v1237_v42 }
 0x1b6   : > { %1199 = vmatmul.mubr.msk.f32.vlgmr.msra.gmra.mrb[8].mxu0 %vm666_vm0, %v908_v46 }
 0x1b8   : > { %1200 = vmatmul.mubr.msk.f32.vlgmr.msra.gmra.mrb[8].mxu1 %vm666_vm0, %v908_v46 }
 0x289   : > { %v978_v49 = vpop.f32.mrb[8].mxu0 }
 0x28a   : > { %v1240_v57 = vadd.f32 %v1239_v40, %v978_v49  ;;  %v980_v51 = vpop.f32.mrb[9].mxu0 }
 0x28b   : > { %v1049_v5 = vpop.f32.mrb[8].mxu1  ;;  %v1242_v60 = vadd.f32 %v1241_v3, %v980_v51 }
 0x28c   : > { %v1058_v52 = vmul.f32 0.5, %v1240_v57  ;;  %v1244_v45 = vadd.f32 %v1243_v4, %v1049_v5  ;;  %v1051_v6 = vpop.f32.mrb[9].mxu1 }
 0x28d   : > { %v1059_v7 = vmul.f32 0.5, %v1242_v60  ;;  %v1246_v8 = vadd.f32 %v1245_v32, %v1051_v6 }
 0x28e   : > { %1372 = vtanh.f32 %v1058_v52  ;;  %v1060_v9 = vmul.f32 0.5, %v1244_v45 }
 0x28f   : > { %1374 = vtanh.f32 %v1059_v7  ;;  %v1061_v34 = vmul.f32 0.5, %v1246_v8 }
 0x290   : > { %1376 = vtanh.f32 %v1060_v9 }
 0x291   : > { %1378 = vtanh.f32 %v1061_v34 }
 0x298   : > { %v1373_v14 = vpop.eup %1372 }
 0x299   : > { %v1375_v11 = vpop.eup %1374  ;;  %v1066_v56 = vadd.f32 1.0, %v1373_v14 }
 0x29a   : > { %v1377_v58 = vpop.eup %1376  ;;  %v1067_v19 = vadd.f32 1.0, %v1375_v11 }
 0x29b   : > { %v1379_v21 = vpop.eup %1378  ;;  %v1070_v16 = vmul.f32 0.5, %v1066_v56  ;;  %v1068_v22 = vadd.f32 1.0, %v1377_v58 }
 0x29c   : > { %v1071_v23 = vmul.f32 0.5, %v1067_v19  ;;  %v1069_v12 = vadd.f32 1.0, %v1379_v21 }
 0x29d   : > { %v1072_v18 = vmul.f32 0.5, %v1068_v22 }
 0x29e   : > { %v1078_v20 = vcombine.low %v1070_v16, %v1071_v23  ;;  %v1073_v2 = vmul.f32 0.5, %v1069_v12 }
 0x2a0   : > { %v1086_v24 = vrot.slane %v1078_v20, %v1085_v25  ;;  %v1079_v17 = vcombine.low %v1072_v18, %v1073_v2 }
 0x2a2   : > { %v1093_v28 = vrot.slane %v1079_v17, %v1085_v25 }
 0x2a4   : > { %v1094_v30 = vcombine.low %v1086_v24, %v1093_v28 }
 0x2a6   : > { %v1101_v35 = vrot.slane %v1094_v30, %v1085_v25 }
 0x2a8   : > { %1107 = vst.msk [vmem:[%s245_s15] sm:$0xf] %vm1105_vm1, %v1101_v35 }
 0x2a9   : > { %1393 = shalt.err (!%p1390_p3)
}
 0x2aa   : > { %s1394_s9 = scalar_lea.hbm %s1771_s19, 64  ;;  %s1398_s12 = scalar_lea.hbm %s1819_s6, 128 }
 0x2ab   : > { %p1395_p4 = scmp.ne.s32.totalorder %s1771_s19, %s1394_s9  ;;  %p1399_p9 = scmp.lt.u32.totalorder %s1771_s19, %s1819_s6 }
 0x2ac   : > { %p1400_p10 = scmp.lt.u32.totalorder %s1398_s12, %s1394_s9  ;;  %p1402_p12 = scmp.lt.u32.totalorder %s1394_s9, %s1771_s19 }
 0x2ad   : > { %p1396_p7 = pnand %p1395_p4, %p1522_p5 }
 0x2ae   : > { %p1401_p11 = por %p1400_p10, %p1399_p9 }
 0x2af   : > { %p1397_p8 = pneg %p1396_p7 }
 0x2b0   : > { %p1403_p13 = por %p1402_p12, %p1401_p11 }
 0x2b2   : > { %p1404_p0 = pnand %p1403_p13, %p1397_p8 }
 0x2b4   : > { %1407 = shalt.err (!%p1404_p0)
}
 0x2b5   : > { %1251 = dma.vmem_to_hbm [thread:$0]  (%p1522_p5), %s1773_s16, 64, %s1771_s19, %s1109_s20  }
 0x2b6 PF: > { %p1257_p1 = scmp.ge.s32.totalorder %s1442_s24, 2  ;;  %s1135_s15 = sand.u32 1, %s1430_s21  }
 0x2b7   : > { %s1136_s17 = scalar_lea.sflag [#allocation3], %s1135_s15 }
 0x2b8   : > { %p1254_p2 = pnand %p1257_p1, %p1526_p6 }
 0x2ba   : > { %1425 = dma.done.wait (!%p1254_p2), %s1136_s17, 64  }
 0x2bb   : > { %1427 = vsyncadd (!%p1254_p2), %s1136_s17, 4294967232  ;;  %p16_p3 = scmp.ge.s32.totalorder %s1509_s27, 4   ;;  %s1822_s21 = smov %s1434_s22 }
 0x2bc   : > { %s1823_s22 = smov %s1438_s23  ;;  %s1824_s23 = smov %s1520_s30 }
 0x2bd   : > { %s1825_s24 = smov %s1509_s27  ;;  %18 = sbr.rel (!%p16_p3) target bundleno = 3 (0x3), region = 79 }
 0x2c4   :  { %1141 = vsyncpa [#allocation3], 1 }
 0x2c5   :  { %1143 = vsyncpa [#allocation3 + $0x1], 1 }

</bundles_post_ra>
